<compile_context>
chip_gen: v7x
topology: tpu7x:2x2x1
jax: 0.10.0
libtpu: 0.0.40
codegen_flags: <defaults>
</compile_context>

<pallas_src>
import functools
import math

import jax
import jax.numpy as jnp
from jax.experimental import pallas as pl
from jax.experimental.pallas import tpu as pltpu

_LANE = 128


def _round_up(v, m):
    return ((int(v) + m - 1) // m) * m


def _pad_axis_to_multiple(a, axis, multiple):
    pad = (-a.shape[axis]) % multiple
    if pad == 0:
        return a
    widths = [(0, 0)] * a.ndim
    widths[axis] = (0, pad)
    return jnp.pad(a, widths)


def _pad_axis_to(a, axis, target):
    pad = target - a.shape[axis]
    if pad <= 0:
        return a
    widths = [(0, 0)] * a.ndim
    widths[axis] = (0, pad)
    return jnp.pad(a, widths)


def _gelu_exact(x):
    # exact erf-based GELU, matching the PyTorch reference `gelu`
    return 0.5 * x * (1.0 + jax.lax.erf(x * (1.0 / math.sqrt(2.0))))


def ffn_kernel(x_ref, w1_ref, b1_ref, w2_ref, b2_ref, o_ref, acc_ref, *,
               gelu_activation, approximate_gelu):
    # One (token-tile i, hidden-chunk k) grid step.
    #   x_ref : (tm, in_p)    token tile, native storage dtype -> MXU
    #   w1_ref: (in_p, tk)    hidden chunk of lin1 weight ([in, out] layout)
    #   b1_ref: (1, tk)       hidden chunk of lin1 bias
    #   w2_ref: (tk, out_p)   hidden chunk of lin2 weight ([in, out] layout)
    #   b2_ref: (1, out_p)    lin2 bias (constant block)
    #   o_ref : (tm, out_p)   lane-dense output tile (written at last chunk)
    #   acc_ref: (tm, out_p)  f32 accumulator scratch, lives across hidden chunks
    k = pl.program_id(1)

    @pl.when(k == 0)
    def _():
        acc_ref[...] = jnp.zeros_like(acc_ref)

    # lin1 on this hidden chunk: f32 accumulation, f32 bias + activation (v5e
    # has no bf16 VPU, so post-matmul math stays f32).
    h = jnp.dot(x_ref[...], w1_ref[...], preferred_element_type=jnp.float32)
    h = h + b1_ref[...].astype(jnp.float32)
    if gelu_activation:
        if approximate_gelu:
            # tanh approximation runs on the EUP slot (use if a bundle dump
            # shows VALU saturated); deviates slightly from the erf reference,
            # hence flag-gated.
            h = jax.nn.gelu(h, approximate=True)
        else:
            h = _gelu_exact(h)
    else:
        h = jnp.maximum(h, 0.0)

    # Partial lin2 contribution of this hidden chunk; lin2 is linear in h, so
    # summing per-chunk contributions in f32 is equivalent to the fused matmul.
    acc_ref[...] += jnp.dot(h.astype(w2_ref.dtype), w2_ref[...],
                            preferred_element_type=jnp.float32)

    @pl.when(k == pl.num_programs(1) - 1)
    def _():
        y = acc_ref[...] + b2_ref[...].astype(jnp.float32)
        # TODO(synk): dropout is identity here (inference / training=False
        # semantics); training parity needs pltpu.prng_seed +
        # pltpu.prng_random_bits masking of y.
        o_ref[...] = y.astype(o_ref.dtype)


def prepare_ffn_params(w1, b1, w2, b2, *, weight_dtype=None):
    """Pad parameters ONCE at load time (not per forward call).

    w1: (in_dim, hidden), b1: (hidden,), w2: (hidden, out_dim), b2: (out_dim,)
    i.e. weights stored pre-transposed in [in, out] layout vs nn.Linear.
    Feature dims are zero-padded to multiples of 128 so every kernel load/store
    is lane-dense and MXU pushes are full width. Optionally cast weights to
    bf16 (MXU-native; halves weight DMA and VMEM residency).
    """
    if weight_dtype is not None:
        w1 = w1.astype(weight_dtype)
        w2 = w2.astype(weight_dtype)
    in_dim, hidden = w1.shape
    out_dim = w2.shape[1]
    return dict(
        w1=_pad_axis_to_multiple(_pad_axis_to_multiple(w1, 0, _LANE), 1, _LANE),
        b1=_pad_axis_to_multiple(b1.reshape(1, -1), 1, _LANE),
        w2=_pad_axis_to_multiple(_pad_axis_to_multiple(w2, 0, _LANE), 1, _LANE),
        b2=_pad_axis_to_multiple(b2.reshape(1, -1), 1, _LANE),
        in_dim=in_dim, hidden=hidden, out_dim=out_dim,
    )


def _vmem_capacity_bytes():
    try:
        return int(pltpu.get_tpu_info().vmem_capacity_bytes)
    except Exception:
        return 64 * 1024 * 1024  # conservative fallback (v7x per-TC VMEM)


def _pick_tm(M):
    # Tiny problems: one grid step (the ~0.35us per-step overhead dominates).
    # Medium problems: guarantee >= 2 "parallel" steps so both v7x TCs get work.
    # Large problems: 512-token tiles (~85% of HBM roofline vs ~63% @ 256).
    if M <= 128:
        return _round_up(max(M, 8), 8)
    if M <= 1024:
        return _round_up((M + 1) // 2, 8)
    return 512


def _pick_tk(hid_p, tk):
    # Hidden chunk width: target 512 (keeps the per-chunk f32 h slab small for
    # v5e's single vst slot) while dividing the padded hidden dim exactly.
    if tk is not None:
        tk = _round_up(tk, _LANE)
        if hid_p % tk == 0:
            return tk
    for cand in (512, 384, 256, 128):
        if hid_p % cand == 0:
            return cand
    return _LANE  # unreachable: hid_p is a multiple of 128


def transformer_ffn(x, params, *, tm=None, tk=None,
                    gelu_activation=True, approximate_gelu=False):
    """Forward pass of TransformerFFN (dropout = identity, i.e. eval mode).

    x: (..., in_dim); params: output of prepare_ffn_params.
    """
    orig_shape = x.shape
    in_dim = orig_shape[-1]
    assert in_dim == params["in_dim"], "input feature dim mismatch"
    out_dim = params["out_dim"]
    M = int(math.prod(orig_shape[:-1])) if len(orig_shape) > 1 else 1
    x2d = x.reshape(M, in_dim)
    out_dtype = x.dtype

    w1_p, b1_p = params["w1"], params["b1"]
    w2_p, b2_p = params["w2"], params["b2"]
    in_p, hid_p = w1_p.shape
    out_p = w2_p.shape[1]

    tm = _pick_tm(M) if tm is None else _round_up(max(int(tm), 8), 8)
    tk = _pick_tk(hid_p, tk)

    # Per-call padding of the activations only (weights were padded at prep).
    x_p = _pad_axis_to_multiple(_pad_axis_to(x2d, 1, in_p), 0, tm)
    Mp = x_p.shape[0]
    grid_m = Mp // tm
    grid_k = hid_p // tk
    single_m = grid_m == 1          # x block index never changes
    single_k = grid_k == 1          # w1/b1/w2 block indices never change

    # Generation-aware VMEM budget: estimate with the actual buffer counts,
    # cap at ~78% of physical VMEM (≈100 MiB on v5e/v6e, ≈50 MiB on v7x).
    w_isz = w1_p.dtype.itemsize
    est = ((1 if single_m else 2) * tm * in_p * x_p.dtype.itemsize
           + 2 * tm * out_p * jnp.dtype(out_dtype).itemsize
           + (1 if single_k else 2) * (in_p * tk + tk * out_p) * w_isz
           + (1 if single_k else 2) * tk * b1_p.dtype.itemsize
           + out_p * b2_p.dtype.itemsize
           + tm * out_p * 4          # f32 accumulator scratch
           + tm * tk * 4)            # headroom for the per-chunk f32 h slab
    vmem_limit = int(min(int(0.78 * _vmem_capacity_bytes()),
                         max(2 * est, 16 * 1024 * 1024)))

    kernel = functools.partial(ffn_kernel,
                               gelu_activation=gelu_activation,
                               approximate_gelu=approximate_gelu)

    def build_call(use_single_buffer):
        def spec(shape, index_map, single):
            if single and use_single_buffer:
                # Constant-index-map blocks don't need double buffering.
                return pl.BlockSpec(shape, index_map,
                                    pipeline_mode=pl.Buffered(1))
            return pl.BlockSpec(shape, index_map)

        return pl.pallas_call(
            kernel,
            out_shape=jax.ShapeDtypeStruct((Mp, out_p), out_dtype),
            grid=(grid_m, grid_k),
            in_specs=[
                spec((tm, in_p), lambda i, k: (i, 0), single_m),
                spec((in_p, tk), lambda i, k: (0, k), single_k),
                spec((1, tk), lambda i, k: (0, k), single_k),
                spec((tk, out_p), lambda i, k: (k, 0), single_k),
                spec((1, out_p), lambda i, k: (0, 0), True),
            ],
            out_specs=pl.BlockSpec((tm, out_p), lambda i, k: (i, 0)),
            scratch_shapes=[pltpu.VMEM((tm, out_p), jnp.float32)],
            compiler_params=pltpu.CompilerParams(
                dimension_semantics=("parallel", "arbitrary"),
                vmem_limit_bytes=vmem_limit),
        )

    try:
        out = build_call(True)(x_p, w1_p, b1_p, w2_p, b2_p)
    except Exception:
        # Fallback: some runtimes may not accept Buffered(1); default buffering
        # is functionally identical (just uses more VMEM).
        out = build_call(False)(x_p, w1_p, b1_p, w2_p, b2_p)

    out = out[:M, :out_dim]
    return out.reshape(*orig_shape[:-1], out_dim)


def reference_ffn(x, w1, b1, w2, b2, gelu_activation=True):
    # HIGHEST precision so the XLA reference is a faithful f32 ground truth.
    hp = jax.lax.Precision.HIGHEST
    h = jnp.dot(x, w1, precision=hp) + b1
    if gelu_activation:
        h = 0.5 * h * (1.0 + jax.lax.erf(h / math.sqrt(2.0)))
    else:
        h = jnp.maximum(h, 0.0)
    return jnp.dot(h, w2, precision=hp) + b2


if __name__ == "__main__":
    key = jax.random.PRNGKey(0)

    def make_case(k, lead_shape, in_dim, hidden, out_dim):
        kx, k1, kb1, k2, kb2 = jax.random.split(k, 5)
        x = jax.random.normal(kx, (*lead_shape, in_dim), jnp.float32)
        bound1 = 1.0 / math.sqrt(in_dim)
        w1 = jax.random.uniform(k1, (in_dim, hidden), jnp.float32, -bound1, bound1)
        b1 = jax.random.uniform(kb1, (hidden,), jnp.float32, -bound1, bound1)
        bound2 = 1.0 / math.sqrt(hidden)
        w2 = jax.random.uniform(k2, (hidden, out_dim), jnp.float32, -bound2, bound2)
        b2 = jax.random.uniform(kb2, (out_dim,), jnp.float32, -bound2, bound2)
        return x, w1, b1, w2, b2

    # Tolerance covers possible reduced-precision (bf16-operand) MXU passes in
    # the kernel's f32 matmuls vs the HIGHEST-precision XLA reference, while
    # still catching structural bugs (missing bias / wrong activation / layout).
    ATOL = RTOL = 1e-2

    # Case 1 — module config: in_dim=32, dim_hidden=64, out_dim=32,
    # dropout=0.1 (identity in eval), gelu_activation=True; batch=2, seq=8.
    B, S, in_dim, hidden, out_dim = 2, 8, 32, 64, 32
    kc1, kc2 = jax.random.split(key)
    x, w1, b1, w2, b2 = make_case(kc1, (B, S), in_dim, hidden, out_dim)
    params = prepare_ffn_params(w1, b1, w2, b2)          # pad once at load time
    out = transformer_ffn(x, params)                     # grid (1, 1)
    out = jax.block_until_ready(out)
    ref = reference_ffn(x.reshape(-1, in_dim), w1, b1, w2, b2).reshape(B, S, out_dim)
    assert out.shape == (B, S, out_dim)
    assert jnp.allclose(out, ref, atol=ATOL, rtol=RTOL), "mismatch vs reference (case 1)"

    # Case 2 — exercises the multi-tile token axis and the hidden-chunk
    # accumulator path: M=320 (grid_m=2), hidden=640 (grid_k=5).
    x2, w1_2, b1_2, w2_2, b2_2 = make_case(kc2, (320,), 96, 640, 80)
    params2 = prepare_ffn_params(w1_2, b1_2, w2_2, b2_2)
    out2 = jax.block_until_ready(transformer_ffn(x2, params2))
    ref2 = reference_ffn(x2, w1_2, b1_2, w2_2, b2_2)
    assert jnp.allclose(out2, ref2, atol=ATOL, rtol=RTOL), "mismatch vs reference (case 2)"

    print("KERNEL_OK")
</pallas_src>

<mosaic_0001>
module attributes {stable_mosaic.version = 11 : i64} {
  func.func @ffn_kernel(%arg0: i32, %arg1: i32, %arg2: memref<16x128xf32, #tpu.memory_space<vmem>>, %arg3: memref<128x128xf32, #tpu.memory_space<vmem>>, %arg4: memref<1x128xf32, #tpu.memory_space<vmem>>, %arg5: memref<128x128xf32, #tpu.memory_space<vmem>>, %arg6: memref<1x128xf32, #tpu.memory_space<vmem>>, %arg7: memref<16x128xf32, #tpu.memory_space<vmem>>, %arg8: memref<16x128xf32, #tpu.memory_space<vmem>>) attributes {dimension_semantics = [#tpu.dimension_semantics<parallel>, #tpu.dimension_semantics<arbitrary>], iteration_bounds = array<i64: 1, 1>, scalar_prefetch = 0 : i64, scratch_operands = 1 : i64, tpu.core_type = #tpu.core_type<tc>, window_params = [{pipeline_mode = #tpu.pipeline_mode<synchronous>, transform_indices = @transform_0, window_bounds = array<i64: 16, 128>}, {pipeline_mode = #tpu.pipeline_mode<synchronous>, transform_indices = @transform_1, window_bounds = array<i64: 128, 128>}, {pipeline_mode = #tpu.pipeline_mode<synchronous>, transform_indices = @transform_2, window_bounds = array<i64: 1, 128>}, {pipeline_mode = #tpu.pipeline_mode<synchronous>, transform_indices = @transform_3, window_bounds = array<i64: 128, 128>}, {pipeline_mode = #tpu.pipeline_mode<synchronous>, transform_indices = @transform_4, window_bounds = array<i64: 1, 128>}, {transform_indices = @transform_5, window_bounds = array<i64: 16, 128>}]} {
    %c0_i32 = arith.constant 0 : i32
    %0 = arith.cmpi eq, %arg1, %c0_i32 : i32
    %1 = arith.extui %0 : i1 to i32
    %c0_i32_0 = arith.constant 0 : i32
    %2 = arith.cmpi ne, %1, %c0_i32_0 : i32
    scf.if %2 {
      %cst_18 = arith.constant 0.000000e+00 : f32
      %25 = vector.broadcast %cst_18 : f32 to vector<16x128xf32>
      %c0_19 = arith.constant 0 : index
      %c0_20 = arith.constant 0 : index
      %26 = vector.load %arg8[%c0_19, %c0_20] : memref<16x128xf32, #tpu.memory_space<vmem>>, vector<16x128xf32>
      tpu.vector_store %arg8[%c0_19, %c0_20], %25 {strides = array<i32>} : memref<16x128xf32, #tpu.memory_space<vmem>>, vector<16x128xf32>,
    } else {
    }
    %c0 = arith.constant 0 : index
    %c0_1 = arith.constant 0 : index
    %3 = vector.load %arg2[%c0, %c0_1] : memref<16x128xf32, #tpu.memory_space<vmem>>, vector<16x128xf32>
    %c0_2 = arith.constant 0 : index
    %c0_3 = arith.constant 0 : index
    %4 = vector.load %arg3[%c0_2, %c0_3] : memref<128x128xf32, #tpu.memory_space<vmem>>, vector<128x128xf32>
    %cst = arith.constant dense<0.000000e+00> : vector<16x128xf32>
    %5 = tpu.matmul %3, %4, %cst {dimension_numbers = #tpu.dot_dimension_numbers<[1], [0], [0], [1], [0, 0, 1, 1], [], []>} : vector<16x128xf32>, vector<128x128xf32>, vector<16x128xf32> -> vector<16x128xf32>
    %c0_4 = arith.constant 0 : index
    %c0_5 = arith.constant 0 : index
    %6 = vector.load %arg4[%c0_4, %c0_5] : memref<1x128xf32, #tpu.memory_space<vmem>>, vector<1x128xf32>
    %7 = vector.broadcast %6 : vector<1x128xf32> to vector<16x128xf32>
    %8 = arith.addf %5, %7 : vector<16x128xf32>
    %cst_6 = arith.constant 5.000000e-01 : f32
    %9 = vector.broadcast %cst_6 : f32 to vector<16x128xf32>
    %10 = arith.mulf %9, %8 : vector<16x128xf32>
    %cst_7 = arith.constant 0.707106769 : f32
    %11 = vector.broadcast %cst_7 : f32 to vector<16x128xf32>
    %12 = arith.mulf %8, %11 : vector<16x128xf32>
    %13 = math.erf %12 : vector<16x128xf32>
    %cst_8 = arith.constant 1.000000e+00 : f32
    %14 = vector.broadcast %cst_8 : f32 to vector<16x128xf32>
    %15 = arith.addf %14, %13 : vector<16x128xf32>
    %16 = arith.mulf %10, %15 : vector<16x128xf32>
    %c0_9 = arith.constant 0 : index
    %c0_10 = arith.constant 0 : index
    %17 = vector.load %arg8[%c0_9, %c0_10] : memref<16x128xf32, #tpu.memory_space<vmem>>, vector<16x128xf32>
    %c0_11 = arith.constant 0 : index
    %c0_12 = arith.constant 0 : index
    %18 = vector.load %arg5[%c0_11, %c0_12] : memref<128x128xf32, #tpu.memory_space<vmem>>, vector<128x128xf32>
    %cst_13 = arith.constant dense<0.000000e+00> : vector<16x128xf32>
    %19 = tpu.matmul %16, %18, %cst_13 {dimension_numbers = #tpu.dot_dimension_numbers<[1], [0], [0], [1], [0, 0, 1, 1], [], []>} : vector<16x128xf32>, vector<128x128xf32>, vector<16x128xf32> -> vector<16x128xf32>
    %20 = arith.addf %17, %19 : vector<16x128xf32>
    %c0_14 = arith.constant 0 : index
    %c0_15 = arith.constant 0 : index
    %21 = vector.load %arg8[%c0_14, %c0_15] : memref<16x128xf32, #tpu.memory_space<vmem>>, vector<16x128xf32>
    tpu.vector_store %arg8[%c0_14, %c0_15], %20 {strides = array<i32>} : memref<16x128xf32, #tpu.memory_space<vmem>>, vector<16x128xf32>,
    %c0_i32_16 = arith.constant 0 : i32
    %22 = arith.cmpi eq, %arg1, %c0_i32_16 : i32
    %23 = arith.extui %22 : i1 to i32
    %c0_i32_17 = arith.constant 0 : i32
    %24 = arith.cmpi ne, %23, %c0_i32_17 : i32
    scf.if %24 {
      %c0_18 = arith.constant 0 : index
      %c0_19 = arith.constant 0 : index
      %25 = vector.load %arg8[%c0_18, %c0_19] : memref<16x128xf32, #tpu.memory_space<vmem>>, vector<16x128xf32>
      %c0_20 = arith.constant 0 : index
      %c0_21 = arith.constant 0 : index
      %26 = vector.load %arg6[%c0_20, %c0_21] : memref<1x128xf32, #tpu.memory_space<vmem>>, vector<1x128xf32>
      %27 = vector.broadcast %26 : vector<1x128xf32> to vector<16x128xf32>
      %28 = arith.addf %25, %27 : vector<16x128xf32>
      %c0_22 = arith.constant 0 : index
      %c0_23 = arith.constant 0 : index
      %29 = vector.load %arg7[%c0_22, %c0_23] : memref<16x128xf32, #tpu.memory_space<vmem>>, vector<16x128xf32>
      tpu.vector_store %arg7[%c0_22, %c0_23], %28 {strides = array<i32>} : memref<16x128xf32, #tpu.memory_space<vmem>>, vector<16x128xf32>,
    } else {
    }
    return
  }
  func.func @transform_0(%arg0: i32, %arg1: i32) -> (i32, i32) {
    %c0_i32 = arith.constant 0 : i32
    %c0_i32_0 = arith.constant 0 : i32
    return %arg0, %c0_i32 : i32, i32
  }
  func.func @transform_1(%arg0: i32, %arg1: i32) -> (i32, i32) {
    %c0_i32 = arith.constant 0 : i32
    %c0_i32_0 = arith.constant 0 : i32
    return %c0_i32, %arg1 : i32, i32
  }
  func.func @transform_2(%arg0: i32, %arg1: i32) -> (i32, i32) {
    %c0_i32 = arith.constant 0 : i32
    %c0_i32_0 = arith.constant 0 : i32
    return %c0_i32, %arg1 : i32, i32
  }
  func.func @transform_3(%arg0: i32, %arg1: i32) -> (i32, i32) {
    %c0_i32 = arith.constant 0 : i32
    %c0_i32_0 = arith.constant 0 : i32
    return %arg1, %c0_i32 : i32, i32
  }
  func.func @transform_4(%arg0: i32, %arg1: i32) -> (i32, i32) {
    %c0_i32 = arith.constant 0 : i32
    %c0_i32_0 = arith.constant 0 : i32
    %c0_i32_1 = arith.constant 0 : i32
    return %c0_i32, %c0_i32_0 : i32, i32
  }
  func.func @transform_5(%arg0: i32, %arg1: i32) -> (i32, i32) {
    %c0_i32 = arith.constant 0 : i32
    %c0_i32_0 = arith.constant 0 : i32
    return %arg0, %c0_i32 : i32, i32
  }
}

module attributes {stable_mosaic.version = 11 : i64} {
  func.func @ffn_kernel(%arg0: i32, %arg1: i32, %arg2: memref<16x128xf32, #tpu.memory_space<vmem>>, %arg3: memref<128x128xf32, #tpu.memory_space<vmem>>, %arg4: memref<1x128xf32, #tpu.memory_space<vmem>>, %arg5: memref<128x128xf32, #tpu.memory_space<vmem>>, %arg6: memref<1x128xf32, #tpu.memory_space<vmem>>, %arg7: memref<16x128xf32, #tpu.memory_space<vmem>>, %arg8: memref<16x128xf32, #tpu.memory_space<vmem>>) attributes {dimension_semantics = [#tpu.dimension_semantics<parallel>, #tpu.dimension_semantics<arbitrary>], iteration_bounds = array<i64: 1, 1>, scalar_prefetch = 0 : i64, scratch_operands = 1 : i64, tpu.core_type = #tpu.core_type<tc>, window_params = [{transform_indices = @transform_0, window_bounds = array<i64: 16, 128>}, {transform_indices = @transform_1, window_bounds = array<i64: 128, 128>}, {transform_indices = @transform_2, window_bounds = array<i64: 1, 128>}, {transform_indices = @transform_3, window_bounds = array<i64: 128, 128>}, {pipeline_mode = #tpu.pipeline_mode<synchronous>, transform_indices = @transform_4, window_bounds = array<i64: 1, 128>}, {transform_indices = @transform_5, window_bounds = array<i64: 16, 128>}]} {
    %c0_i32 = arith.constant 0 : i32
    %0 = arith.cmpi eq, %arg1, %c0_i32 : i32
    %1 = arith.extui %0 : i1 to i32
    %c0_i32_0 = arith.constant 0 : i32
    %2 = arith.cmpi ne, %1, %c0_i32_0 : i32
    scf.if %2 {
      %cst_18 = arith.constant 0.000000e+00 : f32
      %25 = vector.broadcast %cst_18 : f32 to vector<16x128xf32>
      %c0_19 = arith.constant 0 : index
      %c0_20 = arith.constant 0 : index
      %26 = vector.load %arg8[%c0_19, %c0_20] : memref<16x128xf32, #tpu.memory_space<vmem>>, vector<16x128xf32>
      tpu.vector_store %arg8[%c0_19, %c0_20], %25 {strides = array<i32>} : memref<16x128xf32, #tpu.memory_space<vmem>>, vector<16x128xf32>,
    } else {
    }
    %c0 = arith.constant 0 : index
    %c0_1 = arith.constant 0 : index
    %3 = vector.load %arg2[%c0, %c0_1] : memref<16x128xf32, #tpu.memory_space<vmem>>, vector<16x128xf32>
    %c0_2 = arith.constant 0 : index
    %c0_3 = arith.constant 0 : index
    %4 = vector.load %arg3[%c0_2, %c0_3] : memref<128x128xf32, #tpu.memory_space<vmem>>, vector<128x128xf32>
    %cst = arith.constant dense<0.000000e+00> : vector<16x128xf32>
    %5 = tpu.matmul %3, %4, %cst {dimension_numbers = #tpu.dot_dimension_numbers<[1], [0], [0], [1], [0, 0, 1, 1], [], []>} : vector<16x128xf32>, vector<128x128xf32>, vector<16x128xf32> -> vector<16x128xf32>
    %c0_4 = arith.constant 0 : index
    %c0_5 = arith.constant 0 : index
    %6 = vector.load %arg4[%c0_4, %c0_5] : memref<1x128xf32, #tpu.memory_space<vmem>>, vector<1x128xf32>
    %7 = vector.broadcast %6 : vector<1x128xf32> to vector<16x128xf32>
    %8 = arith.addf %5, %7 : vector<16x128xf32>
    %cst_6 = arith.constant 5.000000e-01 : f32
    %9 = vector.broadcast %cst_6 : f32 to vector<16x128xf32>
    %10 = arith.mulf %9, %8 : vector<16x128xf32>
    %cst_7 = arith.constant 0.707106769 : f32
    %11 = vector.broadcast %cst_7 : f32 to vector<16x128xf32>
    %12 = arith.mulf %8, %11 : vector<16x128xf32>
    %13 = math.erf %12 : vector<16x128xf32>
    %cst_8 = arith.constant 1.000000e+00 : f32
    %14 = vector.broadcast %cst_8 : f32 to vector<16x128xf32>
    %15 = arith.addf %14, %13 : vector<16x128xf32>
    %16 = arith.mulf %10, %15 : vector<16x128xf32>
    %c0_9 = arith.constant 0 : index
    %c0_10 = arith.constant 0 : index
    %17 = vector.load %arg8[%c0_9, %c0_10] : memref<16x128xf32, #tpu.memory_space<vmem>>, vector<16x128xf32>
    %c0_11 = arith.constant 0 : index
    %c0_12 = arith.constant 0 : index
    %18 = vector.load %arg5[%c0_11, %c0_12] : memref<128x128xf32, #tpu.memory_space<vmem>>, vector<128x128xf32>
    %cst_13 = arith.constant dense<0.000000e+00> : vector<16x128xf32>
    %19 = tpu.matmul %16, %18, %cst_13 {dimension_numbers = #tpu.dot_dimension_numbers<[1], [0], [0], [1], [0, 0, 1, 1], [], []>} : vector<16x128xf32>, vector<128x128xf32>, vector<16x128xf32> -> vector<16x128xf32>
    %20 = arith.addf %17, %19 : vector<16x128xf32>
    %c0_14 = arith.constant 0 : index
    %c0_15 = arith.constant 0 : index
    %21 = vector.load %arg8[%c0_14, %c0_15] : memref<16x128xf32, #tpu.memory_space<vmem>>, vector<16x128xf32>
    tpu.vector_store %arg8[%c0_14, %c0_15], %20 {strides = array<i32>} : memref<16x128xf32, #tpu.memory_space<vmem>>, vector<16x128xf32>,
    %c0_i32_16 = arith.constant 0 : i32
    %22 = arith.cmpi eq, %arg1, %c0_i32_16 : i32
    %23 = arith.extui %22 : i1 to i32
    %c0_i32_17 = arith.constant 0 : i32
    %24 = arith.cmpi ne, %23, %c0_i32_17 : i32
    scf.if %24 {
      %c0_18 = arith.constant 0 : index
      %c0_19 = arith.constant 0 : index
      %25 = vector.load %arg8[%c0_18, %c0_19] : memref<16x128xf32, #tpu.memory_space<vmem>>, vector<16x128xf32>
      %c0_20 = arith.constant 0 : index
      %c0_21 = arith.constant 0 : index
      %26 = vector.load %arg6[%c0_20, %c0_21] : memref<1x128xf32, #tpu.memory_space<vmem>>, vector<1x128xf32>
      %27 = vector.broadcast %26 : vector<1x128xf32> to vector<16x128xf32>
      %28 = arith.addf %25, %27 : vector<16x128xf32>
      %c0_22 = arith.constant 0 : index
      %c0_23 = arith.constant 0 : index
      %29 = vector.load %arg7[%c0_22, %c0_23] : memref<16x128xf32, #tpu.memory_space<vmem>>, vector<16x128xf32>
      tpu.vector_store %arg7[%c0_22, %c0_23], %28 {strides = array<i32>} : memref<16x128xf32, #tpu.memory_space<vmem>>, vector<16x128xf32>,
    } else {
    }
    return
  }
  func.func @transform_0(%arg0: i32, %arg1: i32) -> (i32, i32) {
    %c0_i32 = arith.constant 0 : i32
    %c0_i32_0 = arith.constant 0 : i32
    return %arg0, %c0_i32 : i32, i32
  }
  func.func @transform_1(%arg0: i32, %arg1: i32) -> (i32, i32) {
    %c0_i32 = arith.constant 0 : i32
    %c0_i32_0 = arith.constant 0 : i32
    return %c0_i32, %arg1 : i32, i32
  }
  func.func @transform_2(%arg0: i32, %arg1: i32) -> (i32, i32) {
    %c0_i32 = arith.constant 0 : i32
    %c0_i32_0 = arith.constant 0 : i32
    return %c0_i32, %arg1 : i32, i32
  }
  func.func @transform_3(%arg0: i32, %arg1: i32) -> (i32, i32) {
    %c0_i32 = arith.constant 0 : i32
    %c0_i32_0 = arith.constant 0 : i32
    return %arg1, %c0_i32 : i32, i32
  }
  func.func @transform_4(%arg0: i32, %arg1: i32) -> (i32, i32) {
    %c0_i32 = arith.constant 0 : i32
    %c0_i32_0 = arith.constant 0 : i32
    %c0_i32_1 = arith.constant 0 : i32
    return %c0_i32, %c0_i32_0 : i32, i32
  }
  func.func @transform_5(%arg0: i32, %arg1: i32) -> (i32, i32) {
    %c0_i32 = arith.constant 0 : i32
    %c0_i32_0 = arith.constant 0 : i32
    return %arg0, %c0_i32 : i32, i32
  }
}

</mosaic_0001>

<bundles_post_ra>
// kernel: tpu_custom_call.1
= control target key start
LH: loop header
LB: loop body
LE: loop exit
PB: predicated region body
PF: predicated region fallthrough
CT: control target
= control target key end

     0   :  { %10 = vsyncpa [#allocation4], 0  ;;  %s694_s0 = inlined_call_operand.hbm [shape: f32[16,128], index: 0, kind: input, shape index: {}]   ;;  %s695_s1 = inlined_call_operand.hbm [shape: f32[128,128], index: 1, kind: input, shape index: {}]   ;;  %s696_s2 = inlined_call_operand.vmem [shape: f32[1,128], index: 2, kind: input, shape index: {}]   ;;  %s697_s3 = inlined_call_operand.hbm [shape: f32[128,128], index: 3, kind: input, shape index: {}]   ;;  %s698_s4 = inlined_call_operand.vmem [shape: f32[1,128], index: 4, kind: input, shape index: {}]   ;;  %s699_s5 = inlined_call_operand.hbm [shape: f32[16,128], index: 5, kind: output, shape index: {}]  }
   0x1   :  { %11 = vsyncpa [#allocation7], 0 }
   0x2   :  { %12 = vsyncpa [#allocation5], 0  ;;  %s585_s18 = smov [#allocation6]   ;;  %s586_s20 = smov [#allocation3]  }
   0x3   :  { %s30_s19 = sshll.u32 %s585_s18, 4  ;;  %s18_s21 = sshll.u32 %s586_s20, 4  ;;  %s31_s19 = int_to_ptr.vmem [resolvable:$true] %s30_s19  ;;  %s621_s21 = int_to_ptr.vmem [resolvable:$true] %s18_s21 }
   0x4   :  { %s491_s24 = scalar_lea.hbm %s695_s1, 2048 }
   0x5   :  { %p492_p0 = scmp.ne.s32.totalorder %s695_s1, %s491_s24  ;;  %p495_p1 = scmp.lt.u32.totalorder %s491_s24, %s695_s1 }
   0x7   :  { %p497_p2 = pnand %p495_p1, %p492_p0 }
   0x9   :  { %500 = shalt.err (!%p497_p2)
}
   0xa   :  { %s501_s29 = scalar_lea.vmem %s31_s19, 2048  ;;  %p506_p4 = scmp.lt.s32.totalorder %s31_s19, %s31_s19 }
   0xb   :  { %p502_p3 = scmp.ne.s32.totalorder %s31_s19, %s501_s29  ;;  %p507_p5 = scmp.lt.s32.totalorder %s501_s29, %s501_s29 }
   0xd   :  { %p508_p6 = por %p507_p5, %p506_p4 }
   0xf   :  { %p509_p7 = pnand %p508_p6, %p502_p3 }
  0x11   :  { %512 = shalt.err (!%p509_p7)
}
  0x12   :  { %s587_s30 = smov 128   ;;  %s588_s6 = smov 8  }
  0x13   :  { %36 = dma.hbm_to_vmem [thread:$0]  %s695_s1, 2048, %s31_s19, [#allocation7], %s587_s30, %s587_s30, %s588_s6  }
  0x14   :  { %s513_s11 = scalar_lea.hbm %s694_s0, 256 }
  0x15   :  { %p514_p8 = scmp.ne.s32.totalorder %s694_s0, %s513_s11  ;;  %p517_p9 = scmp.lt.u32.totalorder %s513_s11, %s694_s0 }
  0x17   :  { %p519_p10 = pnand %p517_p9, %p514_p8 }
  0x19   :  { %522 = shalt.err (!%p519_p10)
}
  0x1a   :  { %s523_s16 = scalar_lea.vmem %s621_s21, 256  ;;  %p528_p12 = scmp.lt.s32.totalorder %s621_s21, %s621_s21 }
  0x1b   :  { %p524_p11 = scmp.ne.s32.totalorder %s621_s21, %s523_s16  ;;  %p529_p13 = scmp.lt.s32.totalorder %s523_s16, %s523_s16 }
  0x1d   :  { %p530_p0 = por %p529_p13, %p528_p12 }
  0x1f   :  { %p531_p1 = pnand %p530_p0, %p524_p11 }
  0x21   :  { %534 = shalt.err (!%p531_p1)
}
  0x22   :  { %24 = dma.hbm_to_vmem [thread:$0]  %s694_s0, 256, %s621_s21, [#allocation4], %s587_s30, %s587_s30, %s588_s6  }
  0x23   :  { %s589_s18 = smov [#allocation8]   ;;  %s535_s23 = scalar_lea.hbm %s697_s3, 2048 }
  0x24   :  { %s44_s19 = sshll.u32 %s589_s18, 4  ;;  %p536_p2 = scmp.ne.s32.totalorder %s697_s3, %s535_s23  ;;  %s45_s19 = int_to_ptr.vmem [resolvable:$true] %s44_s19 }
  0x25   :  { %p539_p3 = scmp.lt.u32.totalorder %s535_s23, %s697_s3 }
  0x27   :  { %p541_p4 = pnand %p539_p3, %p536_p2 }
  0x29   :  { %544 = shalt.err (!%p541_p4)
}
  0x2a   :  { %s545_s28 = scalar_lea.vmem %s45_s19, 2048  ;;  %p550_p6 = scmp.lt.s32.totalorder %s45_s19, %s45_s19 }
  0x2b   :  { %p546_p5 = scmp.ne.s32.totalorder %s45_s19, %s545_s28  ;;  %p551_p7 = scmp.lt.s32.totalorder %s545_s28, %s545_s28 }
  0x2d   :  { %p552_p8 = por %p551_p7, %p550_p6 }
  0x2f   :  { %p553_p9 = pnand %p552_p8, %p546_p5 }
  0x31   :  { %556 = shalt.err (!%p553_p9)
}
  0x32   :  { %50 = dma.hbm_to_vmem [thread:$0]  %s697_s3, 2048, %s45_s19, [#allocation7], %s587_s30, %s587_s30, %s588_s6  }
  0x33   :  { %579 = dma.done.wait [#allocation4], 256  }
  0x34   :  { %580 = vsyncadd [#allocation4], 4294967040 }
  0x35   :  { %581 = dma.done.wait [#allocation7], 4096  }
  0x36   :  { %582 = vsyncadd [#allocation7], 4294963200  ;;  %v70_v0 = vld [vmem:[#allocation6] sm:$0xff]  ;;  %v71_v1 = vld [vmem:[#allocation6 + $0x8] sm:$0xff]  ;;  %s590_s8 = smov [#allocation9]  }
  0x37   :  { %v72_v2 = vld [vmem:[#allocation6 + $0x10] sm:$0xff]  ;;  %v417_v3 = vpack.c.bf16 %v71_v1, %v70_v0  ;;  %v73_v4 = vld [vmem:[#allocation6 + $0x18] sm:$0xff]  ;;  %v74_v6 = vld [vmem:[#allocation6 + $0x20] sm:$0xff]  ;;  %s296_s9 = sshll.u32 %s590_s8, 4  ;;  %s297_s9 = int_to_ptr.vmem [resolvable:$true] %s296_s9 }
  0x38   :  { %v421_v5 = vpack.c.bf16 %v73_v4, %v72_v2  ;;  %v75_v7 = vld [vmem:[#allocation6 + $0x28] sm:$0xff]  ;;  %v76_v9 = vld [vmem:[#allocation6 + $0x30] sm:$0xff]  ;;  %v77_v10 = vld [vmem:[#allocation6 + $0x38] sm:$0xff]  ;;  %s557_s10 = scalar_lea.vmem %s297_s9, 256  ;;  %p562_p11 = scmp.lt.s32.totalorder %s297_s9, %s297_s9 }
  0x39   :  { %418 = vmatprep.subr.bf16.mxu0 %v417_v3  ;;  %v425_v8 = vpack.c.bf16 %v75_v7, %v74_v6  ;;  %v68_v11 = vld [vmem:[#allocation3] sm:$0xff]  ;;  %v180_v12 = vld [vmem:[#allocation8] sm:$0xff]  ;;  %v181_v13 = vld [vmem:[#allocation8 + $0x8] sm:$0xff]  ;;  %v429_v20 = vpack.c.bf16 %v77_v10, %v76_v9  ;;  %p558_p10 = scmp.ne.s32.totalorder %s297_s9, %s557_s10  ;;  %p563_p12 = scmp.lt.s32.totalorder %s557_s10, %s557_s10 }
  0x3a   :  { %420 = vmatpush3.bf16.msra.mxu0 %v417_v3  ;;  %379 = vmatprep.mubr.f32.mxu0 %v68_v11  ;;  %v182_v14 = vld [vmem:[#allocation8 + $0x10] sm:$0xff]  ;;  %v449_v15 = vpack.c.bf16 %v181_v13, %v180_v12  ;;  %v183_v16 = vld [vmem:[#allocation8 + $0x18] sm:$0xff]  ;;  %v184_v18 = vld [vmem:[#allocation8 + $0x20] sm:$0xff] }
  0x3b   :  { %422 = vmatprep.subr.bf16.mxu0 %v421_v5  ;;  %v453_v17 = vpack.c.bf16 %v183_v16, %v182_v14  ;;  %v185_v19 = vld [vmem:[#allocation8 + $0x28] sm:$0xff]  ;;  %v78_v21 = vld [vmem:[#allocation6 + $0x40] sm:$0xff]  ;;  %v80_v25 = vld [vmem:[#allocation6 + $0x50] sm:$0xff]  ;;  %p564_p13 = por %p563_p12, %p562_p11 }
  0x3c   :  { %450 = vmatprep.subr.bf16.mxu1 %v449_v15  ;;  %v79_v22 = vld [vmem:[#allocation6 + $0x48] sm:$0xff]  ;;  %v457_v23 = vpack.c.bf16 %v185_v19, %v184_v18  ;;  %v81_v26 = vld [vmem:[#allocation6 + $0x58] sm:$0xff]  ;;  %v82_v28 = vld [vmem:[#allocation6 + $0x60] sm:$0xff] }
  0x3d   :  { %452 = vmatpush3.bf16.msra.mxu1 %v449_v15  ;;  %v433_v24 = vpack.c.bf16 %v79_v22, %v78_v21  ;;  %v437_v27 = vpack.c.bf16 %v81_v26, %v80_v25  ;;  %v83_v29 = vld [vmem:[#allocation6 + $0x68] sm:$0xff]  ;;  %v84_v31 = vld [vmem:[#allocation6 + $0x70] sm:$0xff]  ;;  %v85_v32 = vld [vmem:[#allocation6 + $0x78] sm:$0xff]  ;;  %p565_p0 = pnand %p564_p13, %p558_p10 }
  0x3e   :  { %424 = vmatpush3.bf16.msra.mxu0 %v421_v5  ;;  %454 = vmatprep.subr.bf16.mxu1 %v453_v17  ;;  %v441_v30 = vpack.c.bf16 %v83_v29, %v82_v28  ;;  %v445_v33 = vpack.c.bf16 %v85_v32, %v84_v31  ;;  %v69_v34 = vld [vmem:[#allocation3 + $0x8] sm:$0xff]  ;;  %v186_v35 = vld [vmem:[#allocation8 + $0x30] sm:$0xff]  ;;  %v188_v38 = vld [vmem:[#allocation8 + $0x40] sm:$0xff] }
  0x3f   :  { %426 = vmatprep.subr.bf16.mxu0 %v425_v8  ;;  %v187_v36 = vld [vmem:[#allocation8 + $0x38] sm:$0xff]  ;;  %v189_v39 = vld [vmem:[#allocation8 + $0x48] sm:$0xff]  ;;  %v190_v41 = vld [vmem:[#allocation8 + $0x50] sm:$0xff] }
  0x40   :  { %v461_v37 = vpack.c.bf16 %v187_v36, %v186_v35  ;;  %v465_v40 = vpack.c.bf16 %v189_v39, %v188_v38  ;;  %v191_v42 = vld [vmem:[#allocation8 + $0x58] sm:$0xff]  ;;  %v192_v44 = vld [vmem:[#allocation8 + $0x60] sm:$0xff]  ;;  %v193_v45 = vld [vmem:[#allocation8 + $0x68] sm:$0xff] }
  0x41   :  { %456 = vmatpush3.bf16.msra.mxu1 %v453_v17  ;;  %v469_v43 = vpack.c.bf16 %v191_v42, %v190_v41  ;;  %v473_v46 = vpack.c.bf16 %v193_v45, %v192_v44  ;;  %v194_v47 = vld [vmem:[#allocation8 + $0x70] sm:$0xff]  ;;  %v195_v48 = vld [vmem:[#allocation8 + $0x78] sm:$0xff] }
  0x42   :  { %428 = vmatpush3.bf16.msra.mxu0 %v425_v8  ;;  %458 = vmatprep.subr.bf16.mxu1 %v457_v23  ;;  %v477_v49 = vpack.c.bf16 %v195_v48, %v194_v47  ;;  %v309_v50 = vld [vmem:[%s696_s2] ss:$0 sm:$0xff] }
  0x43   :  { %430 = vmatprep.subr.bf16.mxu0 %v429_v20  ;;  %v310_v1 = vld [vmem:[%s698_s4] ss:$0 sm:$0xff] }
  0x45   :  { %460 = vmatpush3.bf16.msra.mxu1 %v457_v23 }
  0x46   :  { %432 = vmatpush3.bf16.msra.mxu0 %v429_v20  ;;  %462 = vmatprep.subr.bf16.mxu1 %v461_v37 }
  0x47   :  { %434 = vmatprep.subr.bf16.mxu0 %v433_v24 }
  0x49   :  { %464 = vmatpush3.bf16.msra.mxu1 %v461_v37 }
  0x4a   :  { %436 = vmatpush3.bf16.msra.mxu0 %v433_v24  ;;  %466 = vmatprep.subr.bf16.mxu1 %v465_v40 }
  0x4b   :  { %438 = vmatprep.subr.bf16.mxu0 %v437_v27 }
  0x4d   :  { %468 = vmatpush3.bf16.msra.mxu1 %v465_v40 }
  0x4e   :  { %440 = vmatpush3.bf16.msra.mxu0 %v437_v27  ;;  %470 = vmatprep.subr.bf16.mxu1 %v469_v43 }
  0x4f   :  { %442 = vmatprep.subr.bf16.mxu0 %v441_v30 }
  0x51   :  { %472 = vmatpush3.bf16.msra.mxu1 %v469_v43 }
  0x52   :  { %444 = vmatpush3.bf16.msra.mxu0 %v441_v30  ;;  %474 = vmatprep.subr.bf16.mxu1 %v473_v46 }
  0x53   :  { %446 = vmatprep.subr.bf16.mxu0 %v445_v33 }
  0x55   :  { %476 = vmatpush3.bf16.msra.mxu1 %v473_v46 }
  0x56   :  { %448 = vmatpush3.bf16.msra.mxu0 %v445_v33  ;;  %478 = vmatprep.subr.bf16.mxu1 %v477_v49 }
  0x59   :  { %380 = vmatmul.mubr.f32.vlgmr.msra.gmra.mrb[0].mxu0 %v69_v34  ;;  %480 = vmatpush3.bf16.msra.mxu1 %v477_v49 }
 0x12c   :  { %v381_v51 = vpop.f32.mrb[0].mxu0 }
 0x12d   :  { %v165_v52 = vadd.f32 %v381_v51, %v309_v50  ;;  %v159_v53 = vpop.f32.mrb[1].mxu0 }
 0x12e   :  { %v160_v54 = vadd.f32 %v309_v50, %v159_v53 }
 0x12f   :  { %v171_v55 = vmul.f32 0.70710677, %v165_v52  ;;  %v169_v62 = vmul.f32 0.5, %v165_v52 }
 0x130   :  { %v170_v56 = vmul.f32 0.70710677, %v160_v54  ;;  %v168_v60 = vmul.f32 0.5, %v160_v54 }
 0x131   :  { %487 = verf.f32 %v171_v55 }
 0x132   :  { %489 = verf.f32 %v170_v56 }
 0x13b   :  { %v488_v57 = vpop.eup %487 }
 0x13c   :  { %v490_v58 = vpop.eup %489  ;;  %v175_v59 = vadd.f32 1.0, %v488_v57 }
 0x13d   :  { %v174_v61 = vadd.f32 1.0, %v490_v58 }
 0x13e   :  { %v177_v0 = vmul.f32 %v175_v59, %v169_v62 }
 0x13f   :  { %v176_v63 = vmul.f32 %v174_v61, %v168_v60 }
 0x141   :  { %414 = vmatprep.mubr.f32.mxu1 %v176_v63 }
 0x142   :  { %415 = vmatmul.mubr.f32.vlgmr.msra.gmra.mrb[0].mxu1 %v177_v0 }
 0x215   :  { %v416_v2 = vpop.f32.mrb[0].mxu1 }
 0x216   :  { %v288_v3 = vadd.f32 %v416_v2, %v310_v1  ;;  %v262_v4 = vpop.f32.mrb[1].mxu1 }
 0x217   :  { %v287_v5 = vadd.f32 %v310_v1, %v262_v4 }
 0x218   :  { %290 = vst [vmem:[#allocation9 + $0x8] sm:$0xff] %v288_v3 }
 0x219   :  { %289 = vst [vmem:[#allocation9] sm:$0xff] %v287_v5 }
 0x21a   :  { %568 = shalt.err (!%p565_p0)
}
 0x21b   :  { %s569_s4 = scalar_lea.hbm %s699_s5, 256 }
 0x21c   :  { %p570_p1 = scmp.ne.s32.totalorder %s699_s5, %s569_s4  ;;  %p573_p2 = scmp.lt.u32.totalorder %s569_s4, %s699_s5 }
 0x21e   :  { %p575_p3 = pnand %p573_p2, %p570_p1 }
 0x220   :  { %578 = shalt.err (!%p575_p3)
}
 0x221   :  { %302 = dma.vmem_to_hbm [thread:$0]  %s297_s9, 256, %s699_s5, [#allocation5], %s587_s30, %s587_s30, %s588_s6  }
 0x222   :  { %583 = dma.done.wait [#allocation5], 256  }
 0x223   :  { %584 = vsyncadd [#allocation5], 4294967040 }
 0x224   :  { %306 = vsyncpa [#allocation4], 1 }
 0x225   :  { %307 = vsyncpa [#allocation7], 1 }
 0x226   :  { %308 = vsyncpa [#allocation5], 1 }

// kernel: tpu_custom_call.1
= control target key start
LH: loop header
LB: loop body
LE: loop exit
PB: predicated region body
PF: predicated region fallthrough
CT: control target
= control target key end

     0   :  { %10 = vsyncpa [#allocation4], 0  ;;  %s694_s0 = inlined_call_operand.hbm [shape: f32[16,128], index: 0, kind: input, shape index: {}]   ;;  %s695_s1 = inlined_call_operand.hbm [shape: f32[128,128], index: 1, kind: input, shape index: {}]   ;;  %s696_s2 = inlined_call_operand.vmem [shape: f32[1,128], index: 2, kind: input, shape index: {}]   ;;  %s697_s3 = inlined_call_operand.hbm [shape: f32[128,128], index: 3, kind: input, shape index: {}]   ;;  %s698_s4 = inlined_call_operand.vmem [shape: f32[1,128], index: 4, kind: input, shape index: {}]   ;;  %s699_s5 = inlined_call_operand.hbm [shape: f32[16,128], index: 5, kind: output, shape index: {}]  }
   0x1   :  { %11 = vsyncpa [#allocation7], 0 }
   0x2   :  { %12 = vsyncpa [#allocation5], 0  ;;  %s585_s18 = smov [#allocation6]   ;;  %s586_s20 = smov [#allocation3]  }
   0x3   :  { %s30_s19 = sshll.u32 %s585_s18, 4  ;;  %s18_s21 = sshll.u32 %s586_s20, 4  ;;  %s31_s19 = int_to_ptr.vmem [resolvable:$true] %s30_s19  ;;  %s621_s21 = int_to_ptr.vmem [resolvable:$true] %s18_s21 }
   0x4   :  { %s491_s24 = scalar_lea.hbm %s695_s1, 2048 }
   0x5   :  { %p492_p0 = scmp.ne.s32.totalorder %s695_s1, %s491_s24  ;;  %p495_p1 = scmp.lt.u32.totalorder %s491_s24, %s695_s1 }
   0x7   :  { %p497_p2 = pnand %p495_p1, %p492_p0 }
   0x9   :  { %500 = shalt.err (!%p497_p2)
}
   0xa   :  { %s501_s29 = scalar_lea.vmem %s31_s19, 2048  ;;  %p506_p4 = scmp.lt.s32.totalorder %s31_s19, %s31_s19 }
   0xb   :  { %p502_p3 = scmp.ne.s32.totalorder %s31_s19, %s501_s29  ;;  %p507_p5 = scmp.lt.s32.totalorder %s501_s29, %s501_s29 }
   0xd   :  { %p508_p6 = por %p507_p5, %p506_p4 }
   0xf   :  { %p509_p7 = pnand %p508_p6, %p502_p3 }
  0x11   :  { %512 = shalt.err (!%p509_p7)
}
  0x12   :  { %s587_s30 = smov 128   ;;  %s588_s6 = smov 8  }
  0x13   :  { %36 = dma.hbm_to_vmem [thread:$0]  %s695_s1, 2048, %s31_s19, [#allocation7], %s587_s30, %s587_s30, %s588_s6  }
  0x14   :  { %s513_s11 = scalar_lea.hbm %s694_s0, 256 }
  0x15   :  { %p514_p8 = scmp.ne.s32.totalorder %s694_s0, %s513_s11  ;;  %p517_p9 = scmp.lt.u32.totalorder %s513_s11, %s694_s0 }
  0x17   :  { %p519_p10 = pnand %p517_p9, %p514_p8 }
  0x19   :  { %522 = shalt.err (!%p519_p10)
}
  0x1a   :  { %s523_s16 = scalar_lea.vmem %s621_s21, 256  ;;  %p528_p12 = scmp.lt.s32.totalorder %s621_s21, %s621_s21 }
  0x1b   :  { %p524_p11 = scmp.ne.s32.totalorder %s621_s21, %s523_s16  ;;  %p529_p13 = scmp.lt.s32.totalorder %s523_s16, %s523_s16 }
  0x1d   :  { %p530_p0 = por %p529_p13, %p528_p12 }
  0x1f   :  { %p531_p1 = pnand %p530_p0, %p524_p11 }
  0x21   :  { %534 = shalt.err (!%p531_p1)
}
  0x22   :  { %24 = dma.hbm_to_vmem [thread:$0]  %s694_s0, 256, %s621_s21, [#allocation4], %s587_s30, %s587_s30, %s588_s6  }
  0x23   :  { %s589_s18 = smov [#allocation8]   ;;  %s535_s23 = scalar_lea.hbm %s697_s3, 2048 }
  0x24   :  { %s44_s19 = sshll.u32 %s589_s18, 4  ;;  %p536_p2 = scmp.ne.s32.totalorder %s697_s3, %s535_s23  ;;  %s45_s19 = int_to_ptr.vmem [resolvable:$true] %s44_s19 }
  0x25   :  { %p539_p3 = scmp.lt.u32.totalorder %s535_s23, %s697_s3 }
  0x27   :  { %p541_p4 = pnand %p539_p3, %p536_p2 }
  0x29   :  { %544 = shalt.err (!%p541_p4)
}
  0x2a   :  { %s545_s28 = scalar_lea.vmem %s45_s19, 2048  ;;  %p550_p6 = scmp.lt.s32.totalorder %s45_s19, %s45_s19 }
  0x2b   :  { %p546_p5 = scmp.ne.s32.totalorder %s45_s19, %s545_s28  ;;  %p551_p7 = scmp.lt.s32.totalorder %s545_s28, %s545_s28 }
  0x2d   :  { %p552_p8 = por %p551_p7, %p550_p6 }
  0x2f   :  { %p553_p9 = pnand %p552_p8, %p546_p5 }
  0x31   :  { %556 = shalt.err (!%p553_p9)
}
  0x32   :  { %50 = dma.hbm_to_vmem [thread:$0]  %s697_s3, 2048, %s45_s19, [#allocation7], %s587_s30, %s587_s30, %s588_s6  }
  0x33   :  { %579 = dma.done.wait [#allocation4], 256  }
  0x34   :  { %580 = vsyncadd [#allocation4], 4294967040 }
  0x35   :  { %581 = dma.done.wait [#allocation7], 4096  }
  0x36   :  { %582 = vsyncadd [#allocation7], 4294963200  ;;  %v70_v0 = vld [vmem:[#allocation6] sm:$0xff]  ;;  %v71_v1 = vld [vmem:[#allocation6 + $0x8] sm:$0xff]  ;;  %s590_s8 = smov [#allocation9]  }
  0x37   :  { %v72_v2 = vld [vmem:[#allocation6 + $0x10] sm:$0xff]  ;;  %v417_v3 = vpack.c.bf16 %v71_v1, %v70_v0  ;;  %v73_v4 = vld [vmem:[#allocation6 + $0x18] sm:$0xff]  ;;  %v74_v6 = vld [vmem:[#allocation6 + $0x20] sm:$0xff]  ;;  %s296_s9 = sshll.u32 %s590_s8, 4  ;;  %s297_s9 = int_to_ptr.vmem [resolvable:$true] %s296_s9 }
  0x38   :  { %v421_v5 = vpack.c.bf16 %v73_v4, %v72_v2  ;;  %v75_v7 = vld [vmem:[#allocation6 + $0x28] sm:$0xff]  ;;  %v76_v9 = vld [vmem:[#allocation6 + $0x30] sm:$0xff]  ;;  %v77_v10 = vld [vmem:[#allocation6 + $0x38] sm:$0xff]  ;;  %s557_s10 = scalar_lea.vmem %s297_s9, 256  ;;  %p562_p11 = scmp.lt.s32.totalorder %s297_s9, %s297_s9 }
  0x39   :  { %418 = vmatprep.subr.bf16.mxu0 %v417_v3  ;;  %v425_v8 = vpack.c.bf16 %v75_v7, %v74_v6  ;;  %v68_v11 = vld [vmem:[#allocation3] sm:$0xff]  ;;  %v180_v12 = vld [vmem:[#allocation8] sm:$0xff]  ;;  %v181_v13 = vld [vmem:[#allocation8 + $0x8] sm:$0xff]  ;;  %v429_v20 = vpack.c.bf16 %v77_v10, %v76_v9  ;;  %p558_p10 = scmp.ne.s32.totalorder %s297_s9, %s557_s10  ;;  %p563_p12 = scmp.lt.s32.totalorder %s557_s10, %s557_s10 }
  0x3a   :  { %420 = vmatpush3.bf16.msra.mxu0 %v417_v3  ;;  %379 = vmatprep.mubr.f32.mxu0 %v68_v11  ;;  %v182_v14 = vld [vmem:[#allocation8 + $0x10] sm:$0xff]  ;;  %v449_v15 = vpack.c.bf16 %v181_v13, %v180_v12  ;;  %v183_v16 = vld [vmem:[#allocation8 + $0x18] sm:$0xff]  ;;  %v184_v18 = vld [vmem:[#allocation8 + $0x20] sm:$0xff] }
  0x3b   :  { %422 = vmatprep.subr.bf16.mxu0 %v421_v5  ;;  %v453_v17 = vpack.c.bf16 %v183_v16, %v182_v14  ;;  %v185_v19 = vld [vmem:[#allocation8 + $0x28] sm:$0xff]  ;;  %v78_v21 = vld [vmem:[#allocation6 + $0x40] sm:$0xff]  ;;  %v80_v25 = vld [vmem:[#allocation6 + $0x50] sm:$0xff]  ;;  %p564_p13 = por %p563_p12, %p562_p11 }
  0x3c   :  { %450 = vmatprep.subr.bf16.mxu1 %v449_v15  ;;  %v79_v22 = vld [vmem:[#allocation6 + $0x48] sm:$0xff]  ;;  %v457_v23 = vpack.c.bf16 %v185_v19, %v184_v18  ;;  %v81_v26 = vld [vmem:[#allocation6 + $0x58] sm:$0xff]  ;;  %v82_v28 = vld [vmem:[#allocation6 + $0x60] sm:$0xff] }
  0x3d   :  { %452 = vmatpush3.bf16.msra.mxu1 %v449_v15  ;;  %v433_v24 = vpack.c.bf16 %v79_v22, %v78_v21  ;;  %v437_v27 = vpack.c.bf16 %v81_v26, %v80_v25  ;;  %v83_v29 = vld [vmem:[#allocation6 + $0x68] sm:$0xff]  ;;  %v84_v31 = vld [vmem:[#allocation6 + $0x70] sm:$0xff]  ;;  %v85_v32 = vld [vmem:[#allocation6 + $0x78] sm:$0xff]  ;;  %p565_p0 = pnand %p564_p13, %p558_p10 }
  0x3e   :  { %424 = vmatpush3.bf16.msra.mxu0 %v421_v5  ;;  %454 = vmatprep.subr.bf16.mxu1 %v453_v17  ;;  %v441_v30 = vpack.c.bf16 %v83_v29, %v82_v28  ;;  %v445_v33 = vpack.c.bf16 %v85_v32, %v84_v31  ;;  %v69_v34 = vld [vmem:[#allocation3 + $0x8] sm:$0xff]  ;;  %v186_v35 = vld [vmem:[#allocation8 + $0x30] sm:$0xff]  ;;  %v188_v38 = vld [vmem:[#allocation8 + $0x40] sm:$0xff] }
  0x3f   :  { %426 = vmatprep.subr.bf16.mxu0 %v425_v8  ;;  %v187_v36 = vld [vmem:[#allocation8 + $0x38] sm:$0xff]  ;;  %v189_v39 = vld [vmem:[#allocation8 + $0x48] sm:$0xff]  ;;  %v190_v41 = vld [vmem:[#allocation8 + $0x50] sm:$0xff] }
  0x40   :  { %v461_v37 = vpack.c.bf16 %v187_v36, %v186_v35  ;;  %v465_v40 = vpack.c.bf16 %v189_v39, %v188_v38  ;;  %v191_v42 = vld [vmem:[#allocation8 + $0x58] sm:$0xff]  ;;  %v192_v44 = vld [vmem:[#allocation8 + $0x60] sm:$0xff]  ;;  %v193_v45 = vld [vmem:[#allocation8 + $0x68] sm:$0xff] }
  0x41   :  { %456 = vmatpush3.bf16.msra.mxu1 %v453_v17  ;;  %v469_v43 = vpack.c.bf16 %v191_v42, %v190_v41  ;;  %v473_v46 = vpack.c.bf16 %v193_v45, %v192_v44  ;;  %v194_v47 = vld [vmem:[#allocation8 + $0x70] sm:$0xff]  ;;  %v195_v48 = vld [vmem:[#allocation8 + $0x78] sm:$0xff] }
  0x42   :  { %428 = vmatpush3.bf16.msra.mxu0 %v425_v8  ;;  %458 = vmatprep.subr.bf16.mxu1 %v457_v23  ;;  %v477_v49 = vpack.c.bf16 %v195_v48, %v194_v47  ;;  %v309_v50 = vld [vmem:[%s696_s2] ss:$0 sm:$0xff] }
  0x43   :  { %430 = vmatprep.subr.bf16.mxu0 %v429_v20  ;;  %v310_v1 = vld [vmem:[%s698_s4] ss:$0 sm:$0xff] }
  0x45   :  { %460 = vmatpush3.bf16.msra.mxu1 %v457_v23 }
  0x46   :  { %432 = vmatpush3.bf16.msra.mxu0 %v429_v20  ;;  %462 = vmatprep.subr.bf16.mxu1 %v461_v37 }
  0x47   :  { %434 = vmatprep.subr.bf16.mxu0 %v433_v24 }
  0x49   :  { %464 = vmatpush3.bf16.msra.mxu1 %v461_v37 }
  0x4a   :  { %436 = vmatpush3.bf16.msra.mxu0 %v433_v24  ;;  %466 = vmatprep.subr.bf16.mxu1 %v465_v40 }
  0x4b   :  { %438 = vmatprep.subr.bf16.mxu0 %v437_v27 }
  0x4d   :  { %468 = vmatpush3.bf16.msra.mxu1 %v465_v40 }
  0x4e   :  { %440 = vmatpush3.bf16.msra.mxu0 %v437_v27  ;;  %470 = vmatprep.subr.bf16.mxu1 %v469_v43 }
  0x4f   :  { %442 = vmatprep.subr.bf16.mxu0 %v441_v30 }
  0x51   :  { %472 = vmatpush3.bf16.msra.mxu1 %v469_v43 }
  0x52   :  { %444 = vmatpush3.bf16.msra.mxu0 %v441_v30  ;;  %474 = vmatprep.subr.bf16.mxu1 %v473_v46 }
  0x53   :  { %446 = vmatprep.subr.bf16.mxu0 %v445_v33 }
  0x55   :  { %476 = vmatpush3.bf16.msra.mxu1 %v473_v46 }
  0x56   :  { %448 = vmatpush3.bf16.msra.mxu0 %v445_v33  ;;  %478 = vmatprep.subr.bf16.mxu1 %v477_v49 }
  0x59   :  { %380 = vmatmul.mubr.f32.vlgmr.msra.gmra.mrb[0].mxu0 %v69_v34  ;;  %480 = vmatpush3.bf16.msra.mxu1 %v477_v49 }
 0x12c   :  { %v381_v51 = vpop.f32.mrb[0].mxu0 }
 0x12d   :  { %v165_v52 = vadd.f32 %v381_v51, %v309_v50  ;;  %v159_v53 = vpop.f32.mrb[1].mxu0 }
 0x12e   :  { %v160_v54 = vadd.f32 %v309_v50, %v159_v53 }
 0x12f   :  { %v171_v55 = vmul.f32 0.70710677, %v165_v52  ;;  %v169_v62 = vmul.f32 0.5, %v165_v52 }
 0x130   :  { %v170_v56 = vmul.f32 0.70710677, %v160_v54  ;;  %v168_v60 = vmul.f32 0.5, %v160_v54 }
 0x131   :  { %487 = verf.f32 %v171_v55 }
 0x132   :  { %489 = verf.f32 %v170_v56 }
 0x13b   :  { %v488_v57 = vpop.eup %487 }
 0x13c   :  { %v490_v58 = vpop.eup %489  ;;  %v175_v59 = vadd.f32 1.0, %v488_v57 }
 0x13d   :  { %v174_v61 = vadd.f32 1.0, %v490_v58 }
 0x13e   :  { %v177_v0 = vmul.f32 %v175_v59, %v169_v62 }
 0x13f   :  { %v176_v63 = vmul.f32 %v174_v61, %v168_v60 }
 0x141   :  { %414 = vmatprep.mubr.f32.mxu1 %v176_v63 }
 0x142   :  { %415 = vmatmul.mubr.f32.vlgmr.msra.gmra.mrb[0].mxu1 %v177_v0 }
 0x215   :  { %v416_v2 = vpop.f32.mrb[0].mxu1 }
 0x216   :  { %v288_v3 = vadd.f32 %v416_v2, %v310_v1  ;;  %v262_v4 = vpop.f32.mrb[1].mxu1 }
 0x217   :  { %v287_v5 = vadd.f32 %v310_v1, %v262_v4 }
 0x218   :  { %290 = vst [vmem:[#allocation9 + $0x8] sm:$0xff] %v288_v3 }
 0x219   :  { %289 = vst [vmem:[#allocation9] sm:$0xff] %v287_v5 }
 0x21a   :  { %568 = shalt.err (!%p565_p0)
}
 0x21b   :  { %s569_s4 = scalar_lea.hbm %s699_s5, 256 }
 0x21c   :  { %p570_p1 = scmp.ne.s32.totalorder %s699_s5, %s569_s4  ;;  %p573_p2 = scmp.lt.u32.totalorder %s569_s4, %s699_s5 }
 0x21e   :  { %p575_p3 = pnand %p573_p2, %p570_p1 }
 0x220   :  { %578 = shalt.err (!%p575_p3)
}
 0x221   :  { %302 = dma.vmem_to_hbm [thread:$0]  %s297_s9, 256, %s699_s5, [#allocation5], %s587_s30, %s587_s30, %s588_s6  }
 0x222   :  { %583 = dma.done.wait [#allocation5], 256  }
 0x223   :  { %584 = vsyncadd [#allocation5], 4294967040 }
 0x224   :  { %306 = vsyncpa [#allocation4], 1 }
 0x225   :  { %307 = vsyncpa [#allocation7], 1 }
 0x226   :  { %308 = vsyncpa [#allocation5], 1 }

</bundles_post_ra>
